<compile_context>
chip_gen: v7x
topology: tpu7x:2x2x1
jax: 0.10.0
libtpu: 0.0.40
codegen_flags: <defaults>
</compile_context>

<pallas_src>
import jax
import jax.numpy as jnp
from jax.experimental import pallas as pl
from jax.experimental.pallas import tpu as pltpu


def _round_up(x, m):
    return ((x + m - 1) // m) * m


def _supact_kernel(x_ref, gamma_ref, beta_ref, fac_ref, o_ref):
    # x_ref: (tb, tf) tile; gamma/beta/fac: (1, tf) broadcast over sublanes.
    x = x_ref[...]
    inv = jax.nn.sigmoid(beta_ref[...] * x)          # EUP; free at mem bound
    o_ref[...] = (gamma_ref[...] + inv * fac_ref[...]) * x


def supact(x, gamma, beta, *, target_tile_bytes=2 * 1024 * 1024, max_tf=2048):
    """Supact activation: (gamma + sigmoid(beta*x) * (1-gamma)) * x.

    x: (..., F) float; gamma, beta: (F,)
    """
    orig_shape = x.shape
    F = orig_shape[-1]
    x2 = x.reshape(-1, F)
    B = x2.shape[0]
    itemsize = jnp.dtype(x.dtype).itemsize

    # ---- feature (lane) tile: large multiple of 128 => unmasked vst ----
    tf = min(_round_up(F, 128), max_tf)
    F_pad = _round_up(F, tf)

    # ---- batch (sublane) tile: multiple of 8, ~target_tile_bytes per tile ----
    tb = max(8, (target_tile_bytes // (tf * itemsize)) // 8 * 8)
    tb = min(tb, _round_up(B, 8))
    # Keep >= 2 steps on the parallel batch axis so both v7x TCs get work.
    if B > 8 and pl.cdiv(B, tb) < 2:
        tb = max(8, _round_up(pl.cdiv(B, 2), 8))
    B_pad = _round_up(B, tb)

    # ---- pad to tile multiples; padded region is discarded afterwards ----
    if (B_pad, F_pad) != (B, F):
        x2 = jnp.pad(x2, ((0, B_pad - B), (0, F_pad - F)))
    gamma_p = jnp.pad(gamma.astype(x.dtype), (0, F_pad - F)).reshape(1, F_pad)
    beta_p = jnp.pad(beta.astype(x.dtype), (0, F_pad - F)).reshape(1, F_pad)
    fac_p = (1.0 - gamma_p).astype(x.dtype)   # hoisted out of the kernel body

    grid = (B_pad // tb, F_pad // tf)

    out = pl.pallas_call(
        _supact_kernel,
        out_shape=jax.ShapeDtypeStruct((B_pad, F_pad), x.dtype),
        grid_spec=pltpu.PrefetchScalarGridSpec(
            num_scalar_prefetch=0,
            grid=grid,
            in_specs=[
                pl.BlockSpec((tb, tf), lambda i, j: (i, j)),   # x tile
                pl.BlockSpec((1, tf), lambda i, j: (0, j)),    # gamma
                pl.BlockSpec((1, tf), lambda i, j: (0, j)),    # beta
                pl.BlockSpec((1, tf), lambda i, j: (0, j)),    # fac = 1-gamma
            ],
            out_specs=pl.BlockSpec((tb, tf), lambda i, j: (i, j)),
        ),
        compiler_params=pltpu.CompilerParams(
            dimension_semantics=("parallel", "parallel"),
        ),
    )(x2, gamma_p, beta_p, fac_p)

    if (B_pad, F_pad) != (B, F):
        out = out[:B, :F]
    return out.reshape(orig_shape)


def supact_ref(x, gamma, beta):
    inv = jax.nn.sigmoid(beta * x)
    mult = gamma + inv * (1.0 - gamma)
    return mult * x


if __name__ == "__main__":
    key = jax.random.PRNGKey(0)

    # Small shape consistent with the module (batch of feature vectors);
    # deliberately ragged to exercise padding on both axes.
    B, F = 12, 96
    kx, kx2 = jax.random.split(key)
    x = jax.random.normal(kx, (B, F), dtype=jnp.float32)
    gamma = jnp.ones((F,), jnp.float32) + 0.1 * jnp.cos(
        jnp.arange(F, dtype=jnp.float32))
    beta = jnp.zeros((F,), jnp.float32) + 0.05 * jnp.sin(
        jnp.arange(F, dtype=jnp.float32))

    out = jax.block_until_ready(supact(x, gamma, beta))
    exp = supact_ref(x, gamma, beta)
    assert jnp.allclose(out, exp, atol=1e-5, rtol=1e-5), "mismatch (small)"

    # Moderate shape: exercises the multi-step parallel batch grid.
    B2, F2 = 1024, 384
    x2 = jax.random.normal(kx2, (B2, F2), dtype=jnp.float32)
    g2 = jnp.full((F2,), 0.9, jnp.float32)
    b2 = jnp.full((F2,), 0.1, jnp.float32)
    out2 = jax.block_until_ready(supact(x2, g2, b2))
    exp2 = supact_ref(x2, g2, b2)
    assert jnp.allclose(out2, exp2, atol=1e-5, rtol=1e-5), "mismatch (moderate)"

    print("KERNEL_OK")
</pallas_src>

<mosaic_0001>
module attributes {stable_mosaic.version = 11 : i64} {
  func.func @_supact_kernel(%arg0: i32, %arg1: i32, %arg2: memref<8x128xf32, #tpu.memory_space<vmem>>, %arg3: memref<1x128xf32, #tpu.memory_space<vmem>>, %arg4: memref<1x128xf32, #tpu.memory_space<vmem>>, %arg5: memref<1x128xf32, #tpu.memory_space<vmem>>, %arg6: memref<8x128xf32, #tpu.memory_space<vmem>>) attributes {dimension_semantics = [#tpu.dimension_semantics<parallel>, #tpu.dimension_semantics<parallel>], iteration_bounds = array<i64: 2, 1>, scalar_prefetch = 0 : i64, scratch_operands = 0 : i64, tpu.core_type = #tpu.core_type<tc>, window_params = [{transform_indices = @transform_0, window_bounds = array<i64: 8, 128>}, {transform_indices = @transform_1, window_bounds = array<i64: 1, 128>}, {transform_indices = @transform_2, window_bounds = array<i64: 1, 128>}, {transform_indices = @transform_3, window_bounds = array<i64: 1, 128>}, {transform_indices = @transform_4, window_bounds = array<i64: 8, 128>}]} {
    %c0 = arith.constant 0 : index
    %c0_0 = arith.constant 0 : index
    %0 = vector.load %arg2[%c0, %c0_0] : memref<8x128xf32, #tpu.memory_space<vmem>>, vector<8x128xf32>
    %c0_1 = arith.constant 0 : index
    %c0_2 = arith.constant 0 : index
    %1 = vector.load %arg4[%c0_1, %c0_2] : memref<1x128xf32, #tpu.memory_space<vmem>>, vector<1x128xf32>
    %2 = vector.broadcast %1 : vector<1x128xf32> to vector<8x128xf32>
    %3 = arith.mulf %2, %0 : vector<8x128xf32>
    %4 = arith.negf %3 : vector<8x128xf32>
    %5 = math.exp %4 : vector<8x128xf32>
    %cst = arith.constant 1.000000e+00 : f32
    %6 = vector.broadcast %cst : f32 to vector<8x128xf32>
    %7 = arith.addf %6, %5 : vector<8x128xf32>
    %8 = arith.divf %6, %7 : vector<8x128xf32>
    %c0_3 = arith.constant 0 : index
    %c0_4 = arith.constant 0 : index
    %9 = vector.load %arg3[%c0_3, %c0_4] : memref<1x128xf32, #tpu.memory_space<vmem>>, vector<1x128xf32>
    %c0_5 = arith.constant 0 : index
    %c0_6 = arith.constant 0 : index
    %10 = vector.load %arg5[%c0_5, %c0_6] : memref<1x128xf32, #tpu.memory_space<vmem>>, vector<1x128xf32>
    %11 = vector.broadcast %10 : vector<1x128xf32> to vector<8x128xf32>
    %12 = arith.mulf %8, %11 : vector<8x128xf32>
    %13 = vector.broadcast %9 : vector<1x128xf32> to vector<8x128xf32>
    %14 = arith.addf %13, %12 : vector<8x128xf32>
    %15 = arith.mulf %14, %0 : vector<8x128xf32>
    %c0_7 = arith.constant 0 : index
    %c0_8 = arith.constant 0 : index
    %16 = vector.load %arg6[%c0_7, %c0_8] : memref<8x128xf32, #tpu.memory_space<vmem>>, vector<8x128xf32>
    tpu.vector_store %arg6[%c0_7, %c0_8], %15 {strides = array<i32>} : memref<8x128xf32, #tpu.memory_space<vmem>>, vector<8x128xf32>,
    return
  }
  func.func @transform_0(%arg0: i32, %arg1: i32) -> (i32, i32) {
    %c0_i32 = arith.constant 0 : i32
    return %arg0, %arg1 : i32, i32
  }
  func.func @transform_1(%arg0: i32, %arg1: i32) -> (i32, i32) {
    %c0_i32 = arith.constant 0 : i32
    %c0_i32_0 = arith.constant 0 : i32
    return %c0_i32, %arg1 : i32, i32
  }
  func.func @transform_2(%arg0: i32, %arg1: i32) -> (i32, i32) {
    %c0_i32 = arith.constant 0 : i32
    %c0_i32_0 = arith.constant 0 : i32
    return %c0_i32, %arg1 : i32, i32
  }
  func.func @transform_3(%arg0: i32, %arg1: i32) -> (i32, i32) {
    %c0_i32 = arith.constant 0 : i32
    %c0_i32_0 = arith.constant 0 : i32
    return %c0_i32, %arg1 : i32, i32
  }
  func.func @transform_4(%arg0: i32, %arg1: i32) -> (i32, i32) {
    %c0_i32 = arith.constant 0 : i32
    return %arg0, %arg1 : i32, i32
  }
}

</mosaic_0001>

<bundles_post_ra>
// kernel: tpu_custom_call.1
= control target key start
LH: loop header
LB: loop body
LE: loop exit
PB: predicated region body
PF: predicated region fallthrough
CT: control target
= control target key end

     0   :  { %9 = vsyncpa [#allocation3], 0  ;;  %s844_s0 = inlined_call_operand.hbm [shape: f32[16,128], index: 0, kind: input, shape index: {}]   ;;  %s845_s1 = inlined_call_operand.vmem [shape: f32[1,128], index: 1, kind: input, shape index: {}]   ;;  %s846_s2 = inlined_call_operand.vmem [shape: f32[1,128], index: 2, kind: input, shape index: {}]   ;;  %s847_s3 = inlined_call_operand.vmem [shape: f32[1,128], index: 3, kind: input, shape index: {}]   ;;  %s848_s4 = inlined_call_operand.hbm [shape: f32[16,128], index: 4, kind: output, shape index: {}]  }
   0x1   :  { %11 = vsyncpa [#allocation3 + $0x1], 0 }
   0x2   :  { %12 = vsyncpa [#allocation4], 0 }
   0x3   :  { %14 = vsyncpa [#allocation4 + $0x1], 0  ;;  %s663_s15 = smov 0   ;;  %s665_s16 = smov 0  }
   0x4   :  { %s667_s17 = smov 0   ;;  %s669_s18 = smov 0  }
   0x5   :  { %s671_s19 = smov 0   ;;  %s673_s20 = smov 0  }
   0x6 LB: > { %s436_s21 = sadd.s32 4294967295, %s634_s20   ;;  %s437_s22 = sadd.s32 4294967294, %s634_s20   ;;  %s634_s20 = sphi %s673_s20, %s20_s20   ;;  %s630_s19 = sphi %s671_s19, %s864_s19   ;;  %s626_s18 = sphi %s669_s18, %s863_s18   ;;  %s622_s17 = sphi %s667_s17, %s862_s17   ;;  %s618_s16 = sphi %s665_s16, %s861_s16   ;;  %s614_s15 = sphi %s663_s15, %s860_s15  }
   0x7   : > { %s32_s23 = sadd.s32 1, %s630_s19  ;;  %s41_s24 = sadd.s32 1, %s622_s17 }
   0x8   : > { %p34_p0 = scmp.ge.s32.totalorder %s32_s23, 2  ;;  %p48_p1 = scmp.ne.s32.totalorder %s622_s17, %s618_s16 }
   0x9   : > { %p49_p2 = scmp.eq.s32.totalorder %s634_s20, 0  ;;  %p54_p3 = scmp.ne.s32.totalorder %s618_s16, %s614_s15 }
   0xa   : > { %s866_s23 = smov (%p34_p0, %s32_s23), 0  ;;  %p55_p5 = scmp.eq.s32.totalorder %s436_s21, 0 }
   0xb   : > { %p704_p4 = por %p49_p2, %p48_p1  ;;  %s36_s26 = ssub.s32 %s630_s19, %s866_s23 }
   0xc   : > { %p158_p6 = scmp.eq.s32.totalorder %s436_s21, 1  ;;  %p39_p7 = scmp.eq.s32.totalorder %s36_s26, 0 }
   0xd   : > { %p710_p8 = por %p55_p5, %p54_p3  ;;  %p164_p10 = scmp.eq.s32.totalorder %s437_s22, 1 }
   0xe   : > { %p714_p9 = por %p158_p6, %p48_p1  ;;  %p468_p13 = scmp.lt.s32.totalorder %s634_s20, 2 }
   0xf   : > { %s719_s29 = scalar_select %p39_p7, %s622_s17, %s41_s24  }
  0x10   : > { %s852_s28 = scalar_select %p714_p9, 1, 0 }
  0x11   : > { %p721_p11 = por %p164_p10, %p54_p3  ;;  %s202_s5 = sand.u32 1, %s622_s17  }
  0x12   : > { %s443_s6 = sshll.u32 %s202_s5, 3  ;;  %s444_s7 = sshll.u32 %s630_s19, 7 }
  0x13   : > { %s853_s30 = scalar_select %p721_p11, 1, 0 }
  0x14   : > { %s732_s10 = scalar_lea.hbm %s844_s0, %s444_s7  ;;  %s206_s11 = scalar_lea.vmem [#allocation2], %s443_s6 }
  0x15   : > { %s214_s12 = sshll.u32 %s206_s11, 4  ;;  %p738_p0 = pnand %p468_p13, %p704_p4  ;;  %s734_s12 = int_to_ptr.vmem [resolvable:$true] %s214_s12 }
  0x16   : > { %s203_s14 = scalar_lea.sflag [#allocation3], %s202_s5  ;;  %s522_s21 = scalar_lea.hbm %s732_s10, 128 }
  0x17   : > { %p523_p3 = scmp.ne.s32.totalorder %s732_s10, %s522_s21  ;;  %p524_p5 = pneg %p738_p0 }
  0x18   : > { %s527_s25 = scalar_lea.hbm %s844_s0, 256  ;;  %p528_p4 = scmp.lt.u32.totalorder %s732_s10, %s844_s0 }
  0x19   : > { %p525_p6 = pnand %p524_p5, %p523_p3  ;;  %p529_p10 = scmp.lt.u32.totalorder %s527_s25, %s522_s21 }
  0x1a   : > { %p531_p12 = scmp.lt.u32.totalorder %s522_s21, %s732_s10 }
  0x1b   : > { %p526_p7 = pneg %p525_p6  ;;  %p530_p13 = por %p529_p10, %p528_p4 }
  0x1d   : > { %p532_p1 = por %p531_p12, %p530_p13 }
  0x1f   : > { %p533_p2 = pnand %p532_p1, %p526_p7 }
  0x21   : > { %536 = shalt.err (!%p533_p2)
}
  0x22   : > { %s537_s5 = scalar_lea.vmem %s734_s12, 128  ;;  %s636_s7 = smov [#allocation2]  }
  0x23   : > { %p538_p3 = scmp.ne.s32.totalorder %s734_s12, %s537_s5  ;;  %s542_s8 = sshll.u32 %s636_s7, 4  ;;  %s543_s8 = int_to_ptr.vmem [resolvable:$false] %s542_s8 }
  0x24   : > { %s544_s9 = scalar_lea.vmem %s543_s8, 256  ;;  %p545_p9 = scmp.lt.s32.totalorder %s734_s12, %s543_s8 }
  0x25   : > { %p540_p6 = pnand %p538_p3, %p524_p5  ;;  %p546_p4 = scmp.lt.s32.totalorder %s544_s9, %s537_s5 }
  0x27   : > { %p541_p11 = pneg %p540_p6  ;;  %p547_p10 = por %p546_p4, %p545_p9 }
  0x29   : > { %p548_p12 = pnand %p547_p10, %p541_p11 }
  0x2b   : > { %551 = shalt.err (!%p548_p12)
}
  0x2c   : > { %463 = dma.hbm_to_vmem [thread:$0]  (!%p738_p0), %s732_s10, 128, %s734_s12, %s203_s14  }
  0x2d   : > { %p855_p1 = scmp.lt.s32.totalorder %s634_s20, 3  ;;  %p856_p2 = scmp.ge.s32.totalorder %s634_s20, 1 }
  0x2f   : > { %p220_p5 = pnand %p856_p2, %p855_p1 }
  0x30   : > { %s774_s11 = sand.u32 (!%p220_p5), 1, %s618_s16  }
  0x31   : > { %223 = sbr.rel (%p220_p5) target bundleno = 107 (0x6b), region = 36  ;;  %s446_s21 = sshll.u32 (!%p220_p5), %s774_s11, 3 }
  0x32   : > { %s226_s22 = scalar_lea.sflag (!%p220_p5), [#allocation3], %s774_s11  ;;  %s229_s24 = scalar_lea.vmem (!%p220_p5), [#allocation2], %s446_s21 }
  0x38   : > { %605 = dma.done.wait (%p710_p8), %s226_s22, 128  }
  0x39   : > { %607 = vsyncadd (%p710_p8), %s226_s22, 4294967168  ;;  %v272_v0 = vld [vmem:[%s229_s24] sm:$0xff]  ;;  %s262_s26 = scalar_lea.vmem [#allocation5], %s446_s21  ;;  %s453_s5 = sshll.u32 %s626_s18, 7 }
  0x3a   : > { %v448_v1 = vld [vmem:[%s846_s2] ss:$0 sm:$0xff]  ;;  %s320_s6 = sshll.u32 %s262_s26, 4  ;;  %s797_s9 = scalar_lea.hbm %s848_s4, %s453_s5  ;;  %s792_s6 = int_to_ptr.vmem [resolvable:$true] %s320_s6 }
  0x3b   : > { %v280_v2 = vmul.f32 %v448_v1, %v272_v0  ;;  %v450_v6 = vld [vmem:[%s847_s3] ss:$0 sm:$0xff]  ;;  %s306_s22 = scalar_lea.sflag [#allocation4], %s774_s11  ;;  %s552_s24 = scalar_lea.vmem %s792_s6, 128 }
  0x3c   : > { %v451_v8 = vld [vmem:[%s845_s1] ss:$0 sm:$0xff]  ;;  %p553_p8 = scmp.ne.s32.totalorder %s792_s6, %s552_s24  ;;  %p857_p9 = scmp.ne.s32.totalorder %s852_s28, 0 }
  0x3d   : > { %v449_v3 = vmul.f32 -1.442695, %v280_v2  ;;  %s637_s18 = smov [#allocation5]  }
  0x3e   : > { %p554_p11 = pnand %p553_p8, %p857_p9  ;;  %s556_s21 = sshll.u32 %s637_s18, 4  ;;  %s557_s21 = int_to_ptr.vmem [resolvable:$false] %s556_s21 }
  0x3f   : > { %518 = vpow2.f32 %v449_v3  ;;  %s558_s10 = scalar_lea.vmem %s557_s21, 256  ;;  %p559_p7 = scmp.lt.s32.totalorder %s792_s6, %s557_s21 }
  0x40   : > { %p555_p0 = pneg %p554_p11  ;;  %p560_p13 = scmp.lt.s32.totalorder %s558_s10, %s552_s24 }
  0x42   : > { %p561_p3 = por %p560_p13, %p559_p7 }
  0x44   : > { %p562_p6 = pnand %p561_p3, %p555_p0 }
  0x49   : > { %v519_v4 = vpop.eup %518 }
  0x4a   : > { %v284_v5 = vadd.f32 1.0, %v519_v4 }
  0x4c   : > { %520 = vrcp.f32 %v284_v5 }
  0x56   : > { %v521_v7 = vpop.eup %520 }
  0x57   : > { %v295_v9 = vmul.f32 %v521_v7, %v450_v6 }
  0x59   : > { %v302_v10 = vadd.f32 %v451_v8, %v295_v9 }
  0x5b   : > { %v303_v11 = vmul.f32 %v302_v10, %v272_v0 }
  0x5d   : > { %304 = vst [vmem:[%s262_s26] sm:$0xff] %v303_v11 }
  0x5e   : > { %565 = shalt.err (!%p562_p6)
}
  0x5f   : > { %s566_s11 = scalar_lea.hbm %s797_s9, 128  ;;  %s570_s14 = scalar_lea.hbm %s848_s4, 256 }
  0x60   : > { %p567_p4 = scmp.ne.s32.totalorder %s797_s9, %s566_s11  ;;  %p571_p1 = scmp.lt.u32.totalorder %s797_s9, %s848_s4 }
  0x61   : > { %p572_p2 = scmp.lt.u32.totalorder %s570_s14, %s566_s11  ;;  %p574_p8 = scmp.lt.u32.totalorder %s566_s11, %s797_s9 }
  0x62   : > { %p568_p10 = pnand %p567_p4, %p857_p9 }
  0x63   : > { %p573_p5 = por %p572_p2, %p571_p1 }
  0x64   : > { %p569_p12 = pneg %p568_p10 }
  0x65   : > { %p575_p11 = por %p574_p8, %p573_p5 }
  0x67   : > { %p576_p0 = pnand %p575_p11, %p569_p12 }
  0x69   : > { %579 = shalt.err (!%p576_p0)
}
  0x6a   : > { %458 = dma.vmem_to_hbm [thread:$0]  (%p857_p9), %s792_s6, 128, %s797_s9, %s306_s22  }
  0x6b PF: > { %s332_s26 = sand.u32 1, %s614_s15   ;;  %p858_p7 = scmp.ne.s32.totalorder %s853_s30, 0 }
  0x6c   : > { %p859_p13 = scmp.ge.s32.totalorder %s634_s20, 2  ;;  %s333_s5 = scalar_lea.sflag [#allocation4], %s332_s26 }
  0x6e   : > { %p465_p3 = pnand %p859_p13, %p858_p7 }
  0x70   : > { %609 = dma.done.wait (!%p465_p3), %s333_s5, 128  }
  0x71   : > { %611 = vsyncadd (!%p465_p3), %s333_s5, 4294967168  ;;  %s20_s20 = sadd.s32 1, %s634_s20   ;;  %s860_s15 = smov %s618_s16 }
  0x72   : > { %p17_p6 = scmp.ge.s32.totalorder %s20_s20, 4   ;;  %s861_s16 = smov %s622_s17 }
  0x73   : > { %s862_s17 = smov %s719_s29  ;;  %s863_s18 = smov %s630_s19 }
  0x74   : > { %s864_s19 = smov %s866_s23  ;;  %19 = sbr.rel (!%p17_p6) target bundleno = 6 (0x6), region = 90 }
  0x7b   :  { %338 = vsyncpa [#allocation3], 1 }
  0x7c   :  { %340 = vsyncpa [#allocation3 + $0x1], 1 }
  0x7d   :  { %341 = vsyncpa [#allocation4], 1 }
  0x7e   :  { %343 = vsyncpa [#allocation4 + $0x1], 1 }

</bundles_post_ra>
